<compile_context>
chip_gen: v6e
topology: v6e:2x2x1
jax: 0.10.0
libtpu: 0.0.40
codegen_flags: <defaults>
</compile_context>

<pallas_src>
import jax
import jax.numpy as jnp
from jax.experimental import pallas as pl
from jax.experimental.pallas import tpu as pltpu


def _partial_conv_kernel(xm_ref, msum_ref, w_ref, b_ref, out_ref):
    # (C_out, K) @ (K, TM) on the MXU with f32 accumulation.
    conv = jnp.dot(w_ref[...], xm_ref[...], preferred_element_type=jnp.float32)
    msum = msum_ref[...]                                    # (1, TM) f32, exact small ints
    holes = msum == 0.0
    inv = pl.reciprocal(jnp.where(holes, 1.0, msum), approx=True)   # EUP
    # output_pre = (output - bias) / mask_sum + bias ; conv here is bias-free.
    out = conv * inv + b_ref[...]                           # f32 epilogue, lane-dense
    out_ref[...] = jnp.where(holes, 0.0, out).astype(out_ref.dtype)


def _im2col_t(x, kh, kw, stride, padding):
    """x: (N, C, H, W) -> patches (C*KH*KW, N*OH*OW); K ordered (c, kh, kw)."""
    n, c, h, w = x.shape
    xp = jnp.pad(x, ((0, 0), (0, 0), (padding, padding), (padding, padding)))
    oh = (h + 2 * padding - kh) // stride + 1
    ow = (w + 2 * padding - kw) // stride + 1
    cols = []
    for i in range(kh):
        for j in range(kw):
            cols.append(xp[:, :, i:i + stride * oh:stride, j:j + stride * ow:stride])
    p = jnp.stack(cols, axis=2)              # (N, C, KH*KW, OH, OW)
    p = p.transpose(1, 2, 0, 3, 4)           # (C, KH*KW, N, OH, OW)
    return p.reshape(c * kh * kw, n * oh * ow), oh, ow


def _mask_patch_sum(mask, kh, kw, stride, padding):
    """Per-output-pixel sum of the mask patch (== all-ones mask_conv output), (1, N*OH*OW)."""
    n, c, h, w = mask.shape
    mc = jnp.sum(mask, axis=1)               # reduce channels first: (N, H, W)
    mp = jnp.pad(mc, ((0, 0), (padding, padding), (padding, padding)))
    oh = (h + 2 * padding - kh) // stride + 1
    ow = (w + 2 * padding - kw) // stride + 1
    s = jnp.zeros((n, oh, ow), jnp.float32)
    for i in range(kh):
        for j in range(kw):
            s = s + mp[:, i:i + stride * oh:stride, j:j + stride * ow:stride]
    return s.reshape(1, n * oh * ow)


def partial_conv(x, mask, weight, bias, *, stride=1, padding=0, tile_m=1024,
                 matmul_dtype=jnp.bfloat16):
    """x, mask: (N, C_in, H, W) NCHW float32. weight: (C_out, C_in, KH, KW). bias: (C_out,)."""
    n, c_in, h, w = x.shape
    c_out, _, kh, kw = weight.shape
    k = c_in * kh * kw
    out_dtype = x.dtype

    xm_t, oh, ow = _im2col_t(x * mask, kh, kw, stride, padding)     # (K, M)
    msum = _mask_patch_sum(mask, kh, kw, stride, padding)           # (1, M) f32
    m_rows = xm_t.shape[1]

    # new_mask is fully determined by the mask patch sum -> compute in wrapper.
    new_mask = jnp.broadcast_to(
        (msum > 0.0).astype(out_dtype).reshape(n, 1, oh, ow), (n, c_out, oh, ow))

    # Lane-dense tiling along M: multiple of 128, clamped to problem size.
    tile_m = max(128, min(tile_m, ((m_rows + 127) // 128) * 128))
    m_pad = -m_rows % tile_m
    if m_pad:
        xm_t = jnp.pad(xm_t, ((0, 0), (0, m_pad)))
        msum = jnp.pad(msum, ((0, 0), (0, m_pad)))      # padded cols => holes => 0
    m_total = m_rows + m_pad

    xm_t = xm_t.astype(matmul_dtype)                    # streamed matmul operand (bf16)
    w_t = weight.reshape(c_out, k).astype(matmul_dtype) # (C_out, K), resident
    msum = msum.astype(jnp.float32)
    b_col = bias.reshape(c_out, 1).astype(jnp.float32)

    out = pl.pallas_call(
        _partial_conv_kernel,
        out_shape=jax.ShapeDtypeStruct((c_out, m_total), out_dtype),
        grid_spec=pltpu.PrefetchScalarGridSpec(
            num_scalar_prefetch=0,
            grid=(m_total // tile_m,),
            in_specs=[
                pl.BlockSpec((k, tile_m), lambda i: (0, i)),    # (x*mask) patches (bf16)
                pl.BlockSpec((1, tile_m), lambda i: (0, i)),    # mask patch sums (f32)
                pl.BlockSpec((c_out, k), lambda i: (0, 0)),     # flattened weight (bf16)
                pl.BlockSpec((c_out, 1), lambda i: (0, 0)),     # bias column (f32)
            ],
            out_specs=pl.BlockSpec((c_out, tile_m), lambda i: (0, i)),
        ),
        compiler_params=pltpu.CompilerParams(
            dimension_semantics=("parallel",),
            # NOTE: tiles here are tiny (K=36). For large C_in (K in the 100s-1000s)
            # on v7x (64 MiB VMEM) shrink tile_m or add a K grid axis + acc scratch
            # and set vmem_limit_bytes explicitly.
        ),
    )(xm_t, msum, w_t, b_col)

    out = out[:, :m_rows].reshape(c_out, n, oh, ow).transpose(1, 0, 2, 3)
    return out, new_mask


def _reference(x, mask, weight, bias, stride, padding):
    """Pure-JAX f32 reference mirroring the PyTorch forward (for validation)."""
    dn = ("NCHW", "OIHW", "NCHW")
    conv = lambda a, wgt: jax.lax.conv_general_dilated(
        a, wgt, (stride, stride), [(padding, padding)] * 2, dimension_numbers=dn)
    b = bias.reshape(1, -1, 1, 1)
    out = conv(x * mask, weight) + b
    out_mask = conv(mask, jnp.ones_like(weight))
    holes = out_mask == 0
    mask_sum = jnp.where(holes, 1.0, out_mask)
    out_pre = (out - b) / mask_sum + b
    out = jnp.where(holes, 0.0, out_pre)
    new_mask = jnp.where(holes, jnp.zeros_like(out), jnp.ones_like(out))
    return out, new_mask


if __name__ == "__main__":
    key = jax.random.PRNGKey(0)
    k_x, k_m, k_w = jax.random.split(key, 3)

    # Shapes consistent with PartialConv(in_channels=4, out_channels=8, kernel_size=3,
    # stride=1, padding=1, bias=True) applied to a (2, 4, 16, 16) NCHW input.
    N, C_IN, H, W = 2, 4, 16, 16
    C_OUT, KH, KW = 8, 3, 3
    STRIDE, PADDING = 1, 1

    x = jax.random.normal(k_x, (N, C_IN, H, W), dtype=jnp.float32)
    # Binary hole mask (same shape as input, per-channel, like the PyTorch module expects).
    mask = (jax.random.uniform(k_m, (N, C_IN, H, W)) > 0.5).astype(jnp.float32)

    # Deterministic "kaiming_normal_(fan_in)" init; bias constant 0.0 per weights_init('kaiming').
    fan_in = C_IN * KH * KW
    weight = jax.random.normal(k_w, (C_OUT, C_IN, KH, KW), dtype=jnp.float32) * jnp.sqrt(2.0 / fan_in)
    bias = jnp.zeros((C_OUT,), dtype=jnp.float32)

    out, new_mask = partial_conv(x, mask, weight, bias, stride=STRIDE, padding=PADDING)
    out, new_mask = jax.block_until_ready((out, new_mask))

    ref_out, ref_mask = _reference(x, mask, weight, bias, STRIDE, PADDING)
    assert out.shape == (N, C_OUT, H, W) and new_mask.shape == (N, C_OUT, H, W)
    # bf16 matmul operands + approx reciprocal => compare to the f32 reference at ~1e-2.
    assert jnp.allclose(out, ref_out, atol=1e-2, rtol=1e-2)
    assert jnp.allclose(new_mask, ref_mask)

    print("KERNEL_OK")
</pallas_src>

<mosaic_0001>
module attributes {stable_mosaic.version = 11 : i64} {
  func.func @_partial_conv_kernel(%arg0: i32, %arg1: memref<36x512xbf16, #tpu.memory_space<vmem>>, %arg2: memref<1x512xf32, #tpu.memory_space<vmem>>, %arg3: memref<8x36xbf16, #tpu.memory_space<vmem>>, %arg4: memref<8x1xf32, #tpu.memory_space<vmem>>, %arg5: memref<8x512xf32, #tpu.memory_space<vmem>>) attributes {dimension_semantics = [#tpu.dimension_semantics<parallel>], iteration_bounds = array<i64: 1>, scalar_prefetch = 0 : i64, scratch_operands = 0 : i64, tpu.core_type = #tpu.core_type<tc>, window_params = [{transform_indices = @transform_0, window_bounds = array<i64: 36, 512>}, {transform_indices = @transform_1, window_bounds = array<i64: 1, 512>}, {pipeline_mode = #tpu.pipeline_mode<synchronous>, transform_indices = @transform_2, window_bounds = array<i64: 8, 36>}, {pipeline_mode = #tpu.pipeline_mode<synchronous>, transform_indices = @transform_3, window_bounds = array<i64: 8, 1>}, {transform_indices = @transform_4, window_bounds = array<i64: 8, 512>}]} {
    %c0 = arith.constant 0 : index
    %c0_0 = arith.constant 0 : index
    %0 = vector.load %arg3[%c0, %c0_0] : memref<8x36xbf16, #tpu.memory_space<vmem>>, vector<8x36xbf16>
    %c0_1 = arith.constant 0 : index
    %c0_2 = arith.constant 0 : index
    %1 = vector.load %arg1[%c0_1, %c0_2] : memref<36x512xbf16, #tpu.memory_space<vmem>>, vector<36x512xbf16>
    %cst = arith.constant dense<0.000000e+00> : vector<8x512xf32>
    %2 = tpu.matmul %0, %1, %cst {dimension_numbers = #tpu.dot_dimension_numbers<[1], [0], [0], [1], [0, 0, 1, 1], [], []>} : vector<8x36xbf16>, vector<36x512xbf16>, vector<8x512xf32> -> vector<8x512xf32>
    %c0_3 = arith.constant 0 : index
    %c0_4 = arith.constant 0 : index
    %3 = vector.load %arg2[%c0_3, %c0_4] : memref<1x512xf32, #tpu.memory_space<vmem>>, vector<1x512xf32>
    %cst_5 = arith.constant 0.000000e+00 : f32
    %4 = vector.broadcast %cst_5 : f32 to vector<1x512xf32>
    %5 = arith.cmpf oeq, %3, %4 : vector<1x512xf32>
    %cst_6 = arith.constant 1.000000e+00 : f32
    %6 = vector.broadcast %cst_6 : f32 to vector<1x512xf32>
    %7 = arith.select %5, %6, %3 : vector<1x512xi1>, vector<1x512xf32>
    %8 = tpu.reciprocal %7 {approx = true} : vector<1x512xf32> -> vector<1x512xf32>
    %9 = vector.broadcast %8 : vector<1x512xf32> to vector<8x512xf32>
    %10 = arith.mulf %2, %9 : vector<8x512xf32>
    %c0_7 = arith.constant 0 : index
    %c0_8 = arith.constant 0 : index
    %11 = vector.load %arg4[%c0_7, %c0_8] : memref<8x1xf32, #tpu.memory_space<vmem>>, vector<8x1xf32>
    %12 = vector.broadcast %11 : vector<8x1xf32> to vector<8x512xf32>
    %13 = arith.addf %10, %12 : vector<8x512xf32>
    %cst_9 = arith.constant 0.000000e+00 : f32
    %14 = vector.shape_cast %5 : vector<1x512xi1> to vector<1x512xi1>
    %15 = vector.broadcast %14 : vector<1x512xi1> to vector<8x512xi1>
    %16 = vector.broadcast %cst_9 : f32 to vector<8x512xf32>
    %17 = arith.select %15, %16, %13 : vector<8x512xi1>, vector<8x512xf32>
    %c0_10 = arith.constant 0 : index
    %c0_11 = arith.constant 0 : index
    %18 = vector.load %arg5[%c0_10, %c0_11] : memref<8x512xf32, #tpu.memory_space<vmem>>, vector<8x512xf32>
    tpu.vector_store %arg5[%c0_10, %c0_11], %17 {strides = array<i32>} : memref<8x512xf32, #tpu.memory_space<vmem>>, vector<8x512xf32>,
    return
  }
  func.func @transform_0(%arg0: i32) -> (i32, i32) {
    %c0_i32 = arith.constant 0 : i32
    %c0_i32_0 = arith.constant 0 : i32
    return %c0_i32, %arg0 : i32, i32
  }
  func.func @transform_1(%arg0: i32) -> (i32, i32) {
    %c0_i32 = arith.constant 0 : i32
    %c0_i32_0 = arith.constant 0 : i32
    return %c0_i32, %arg0 : i32, i32
  }
  func.func @transform_2(%arg0: i32) -> (i32, i32) {
    %c0_i32 = arith.constant 0 : i32
    %c0_i32_0 = arith.constant 0 : i32
    %c0_i32_1 = arith.constant 0 : i32
    return %c0_i32, %c0_i32_0 : i32, i32
  }
  func.func @transform_3(%arg0: i32) -> (i32, i32) {
    %c0_i32 = arith.constant 0 : i32
    %c0_i32_0 = arith.constant 0 : i32
    %c0_i32_1 = arith.constant 0 : i32
    return %c0_i32, %c0_i32_0 : i32, i32
  }
  func.func @transform_4(%arg0: i32) -> (i32, i32) {
    %c0_i32 = arith.constant 0 : i32
    %c0_i32_0 = arith.constant 0 : i32
    return %c0_i32, %arg0 : i32, i32
  }
}

</mosaic_0001>

<bundles_post_ra>
// kernel: tpu_custom_call.1
= control target key start
LH: loop header
LB: loop body
LE: loop exit
PB: predicated region body
PF: predicated region fallthrough
CT: control target
= control target key end

     0   :  { %9 = vsyncpa [#allocation3], 0  ;;  %s405_s0 = inlined_call_operand.hbm [shape: bf16[36,512], index: 0, kind: input, shape index: {}]   ;;  %s406_s1 = inlined_call_operand.vmem [shape: f32[1,512], index: 1, kind: input, shape index: {}]   ;;  %s407_s2 = inlined_call_operand.vmem [shape: bf16[8,36], index: 2, kind: input, shape index: {}]   ;;  %s408_s3 = inlined_call_operand.vmem [shape: f32[8,1], index: 3, kind: input, shape index: {}]   ;;  %s409_s4 = inlined_call_operand.hbm [shape: f32[8,512], index: 4, kind: output, shape index: {}]  }
   0x1   :  { %10 = vsyncpa [#allocation4], 0  ;;  %s360_s15 = smov [#allocation2]  }
   0x2   :  { %s16_s16 = sshll.u32 %s360_s15, 4  ;;  %s17_s16 = int_to_ptr.vmem [resolvable:$true] %s16_s16 }
   0x3   :  { %s324_s17 = scalar_lea.vmem %s17_s16, 1280  ;;  %p329_p1 = scmp.lt.s32.totalorder %s17_s16, %s17_s16 }
   0x4   :  { %p325_p0 = scmp.ne.s32.totalorder %s17_s16, %s324_s17  ;;  %p330_p2 = scmp.lt.s32.totalorder %s324_s17, %s324_s17 }
   0x6   :  { %p331_p3 = por %p330_p2, %p329_p1 }
   0x8   :  { %p332_p4 = pnand %p331_p3, %p325_p0 }
   0xa   :  { %335 = shalt.err (!%p332_p4)
}
   0xb   :  { %s361_s18 = smov 256   ;;  %s362_s19 = smov 16  }
   0xc   :  { %22 = dma.hbm_to_vmem [thread:$0]  %s405_s0, 1280, %s17_s16, [#allocation3], %s361_s18, %s361_s18, %s362_s19  }
   0xd   :  { %356 = dma.done.wait [#allocation3], 1280  }
   0xe   :  { %357 = vsyncadd [#allocation3], 4294966016  ;;  %v363_v0 = vmov 0   ;;  %v42_v1 = vld [vmem:[#allocation2 + $0x40] sm:$0x33]  ;;  %vm98_vm0 = vcmask 1041408   ;;  %v198_v21 = vlaneseq }
   0xf   :  { %143 = vmatprep.mubr.bf16.mxu0 %v363_v0  ;;  %184 = vmatprep.mubr.bf16.mxu1 %v363_v0  ;;  %v43_v2 = vld [vmem:[#allocation2 + $0x48] sm:$0x33]  ;;  %v285_v3 = vcombine.high %v42_v1, %v42_v1  ;;  %v284_v5 = vcombine.low %v42_v1, %v42_v1  ;;  %v302_v7 = vld [vmem:[#allocation2 + $0x24] ss:$16 sps:$4 sm:$0xff]   ;;  %v306_v11 = vld [vmem:[#allocation2 + $0x20] ss:$16 sps:$4 sm:$0xff]  }
  0x10   :  { %297 = vset.pattern.permute.xlu0 %v363_v0  ;;  %v287_v4 = vcombine.high %v43_v2, %v43_v2  ;;  %v286_v6 = vcombine.low %v43_v2, %v43_v2  ;;  %v304_v8 = vld [vmem:[#allocation2 + $0x2c] ss:$16 sps:$4 sm:$0xff]   ;;  %v307_v12 = vld [vmem:[#allocation2 + $0x28] ss:$16 sps:$4 sm:$0xff]   ;;  %v308_v13 = vld [vmem:[#allocation2 + $0x4] ss:$16 sps:$4 sm:$0xff]  }
  0x11   :  { %288 = vmatprep.subr.msk.bf16.mxu0 %vm98_vm0, %v285_v3  ;;  %v100_v9 = vsel %vm98_vm0, %v284_v5, 0  ;;  %v310_v14 = vld [vmem:[#allocation2 + $0xc] ss:$16 sps:$4 sm:$0xff]   ;;  %v222_v15 = vld [vmem:[%s408_s3] sm:$0xff]  ;;  %v313_v17 = vld [vmem:[#allocation2 + $0x8] ss:$16 sps:$4 sm:$0xff]  }
  0x12   :  { %290 = vmatprep.subr.msk.bf16.mxu1 %vm98_vm0, %v287_v4  ;;  %v106_v10 = vsel %vm98_vm0, %v286_v6, 0  ;;  %122 = vmatpush1.bf16.msra.mxu0 %v100_v9  ;;  %v312_v16 = vld [vmem:[#allocation2] ss:$16 sps:$4 sm:$0xff]   ;;  %vm94_vm1 = vcmask 293888   ;;  %v199_v22 = vshrl.u32 %v198_v21, 7 }
  0x13   :  { %163 = vmatpush1.bf16.msra.mxu1 %v106_v10  ;;  %123 = vmatprep.subr.bf16.mxu0 %v302_v7  ;;  %v33_v18 = vld [vmem:[%s407_s2] sm:$0xf] }
  0x14   :  { %164 = vmatprep.subr.bf16.mxu1 %v304_v8  ;;  %225 = vperm.xlu0 %297, %v222_v15   ;;  %v193_v19 = vld [vmem:[%s406_s1] sm:$0xf]  ;;  %v200_v23 = vsub.s32 0, %v199_v22  ;;  %v208_v24 = vsub.s32 2, %v199_v22  ;;  %v204_v27 = vsub.s32 1, %v199_v22  ;;  %v212_v28 = vsub.s32 3, %v199_v22 }
  0x15   :  { %vm194_vm2 = vcmp.eq.f32.partialorder %v193_v19, 0.0  ;;  %s364_s1 = smov [#allocation5]  }
  0x16   :  { %124 = vmatpush1.bf16.msra.mxu0 %v306_v11  ;;  %v195_v20 = vsel %vm194_vm2, 1.0, %v193_v19  ;;  %v232_v26 = vsel %vm194_vm2, 1, %v363_v0  ;;  %s267_s2 = sshll.u32 %s364_s1, 4  ;;  %s268_s2 = int_to_ptr.vmem [resolvable:$true] %s267_s2 }
  0x17   :  { %165 = vmatpush1.bf16.msra.mxu1 %v307_v12  ;;  %125 = vmatprep.subr.bf16.mxu0 %v308_v13  ;;  %314 = vrcp.f32 %v195_v20  ;;  %v236_v31 = vrot.slane %v232_v26, %v200_v23  ;;  %v244_v32 = vrot.slane %v232_v26, %v208_v24  ;;  %v240_v38 = vrot.slane %v232_v26, %v204_v27  ;;  %s336_s3 = scalar_lea.vmem %s268_s2, 512  ;;  %p341_p6 = scmp.lt.s32.totalorder %s268_s2, %s268_s2 }
  0x18   :  { %166 = vmatprep.subr.bf16.mxu1 %v310_v14  ;;  %v248_v39 = vrot.slane %v232_v26, %v212_v28  ;;  %p337_p5 = scmp.ne.s32.totalorder %s268_s2, %s336_s3  ;;  %p342_p7 = scmp.lt.s32.totalorder %s336_s3, %s336_s3 }
  0x19   :  { %vm249_vm3 = vcmp.eq.s32.totalorder %v236_v31, 1  ;;  %vm251_vm4 = vcmp.eq.s32.totalorder %v244_v32, 1  ;;  %vm250_vm5 = vcmp.eq.s32.totalorder %v240_v38, 1 }
  0x1a   :  { %126 = vmatpush1.bf16.msra.mxu0 %v312_v16  ;;  %vm252_vm6 = vcmp.eq.s32.totalorder %v248_v39, 1  ;;  %p343_p8 = por %p342_p7, %p341_p6 }
  0x1b   :  { %167 = vmatpush1.bf16.msra.mxu1 %v313_v17 }
  0x1c   :  { %p344_p9 = pnand %p343_p8, %p337_p5 }
  0x1d   :  { %289 = vmatmul.mubr.msk.bf16.vlgmr.msra.gmra.mxu0 %vm94_vm1, %v33_v18 }
  0x1e   :  { %291 = vmatmul.mubr.msk.bf16.vlgmr.msra.gmra.mxu1 %vm94_vm1, %v33_v18 }
  0x24   :  { %v315_v25 = vpop.eup %314 }
  0x25   :  { %v201_v29 = vrot.slane %v315_v25, %v200_v23  ;;  %v209_v30 = vrot.slane %v315_v25, %v208_v24  ;;  %v205_v34 = vrot.slane %v315_v25, %v204_v27  ;;  %v213_v35 = vrot.slane %v315_v25, %v212_v28 }
  0x8f   :  { %v226_v33 = vpop.permute.xlu0 %225 }
  0xdd   :  { %v145_v36 = vpop.f32.mrf.mxu0 }
  0xde   :  { %v186_v37 = vpop.f32.mrf.mxu1  ;;  %v218_v40 = vmul.f32 %v201_v29, %v145_v36 }
  0xdf   :  { %v220_v41 = vmul.f32 %v209_v30, %v186_v37  ;;  %v147_v42 = vpop.f32.mrf.mxu0 }
  0xe0   :  { %v188_v43 = vpop.f32.mrf.mxu1  ;;  %v228_v44 = vadd.f32 %v226_v33, %v218_v40  ;;  %v219_v46 = vmul.f32 %v205_v34, %v147_v42 }
  0xe1   :  { %v230_v45 = vadd.f32 %v226_v33, %v220_v41  ;;  %v221_v47 = vmul.f32 %v213_v35, %v188_v43  ;;  %v149_v48 = vpop.f32.mrf.mxu0 }
  0xe2   :  { %v190_v49 = vpop.f32.mrf.mxu1  ;;  %v253_v50 = vsel %vm249_vm3, 0.0, %v228_v44  ;;  %v229_v52 = vadd.f32 %v226_v33, %v219_v46 }
  0xe3   :  { %v255_v51 = vsel %vm251_vm4, 0.0, %v230_v45  ;;  %v231_v53 = vadd.f32 %v226_v33, %v221_v47  ;;  %257 = vst [vmem:[#allocation5] sm:$0xff] %v253_v50  ;;  %v150_v54 = vpop.f32.mrf.mxu0 }
  0xe4   :  { %259 = vst [vmem:[#allocation5 + $0x10] sm:$0xff] %v255_v51  ;;  %v191_v55 = vpop.f32.mrf.mxu1  ;;  %v254_v56 = vsel %vm250_vm5, 0.0, %v229_v52 }
  0xe5   :  { %v256_v57 = vsel %vm252_vm6, 0.0, %v231_v53  ;;  %258 = vst [vmem:[#allocation5 + $0x8] sm:$0xff] %v254_v56 }
  0xe6   :  { %260 = vst [vmem:[#allocation5 + $0x18] sm:$0xff] %v256_v57 }
  0xe7   :  { %347 = shalt.err (!%p344_p9)
}
  0xe8   :  { %270 = dma.vmem_to_hbm [thread:$0]  %s268_s2, 512, %s409_s4, [#allocation4]  }
  0xe9   :  { %358 = dma.done.wait [#allocation4], 512  }
  0xea   :  { %359 = vsyncadd [#allocation4], 4294966784 }
  0xeb   :  { %274 = vsyncpa [#allocation3], 1 }
  0xec   :  { %275 = vsyncpa [#allocation4], 1 }

</bundles_post_ra>
